<compile_context>
chip_gen: v7x
topology: tpu7x:2x2x1
jax: 0.10.0
libtpu: 0.0.40
codegen_flags: <defaults>
</compile_context>

<pallas_src>
import functools

import numpy as np
import jax
import jax.numpy as jnp
from jax.experimental import pallas as pl
from jax.experimental.pallas import tpu as pltpu


def _obj_loss_kernel(boxes_ref, counts_ref, probs_ref, out_ref, *, maxn, bt):
    """One grid step == `bt` images.

    boxes_ref  : SMEM (B*maxn*4,) int32 -- [u1,v1,u2,v2] per box, per image,
                                           sorted by descending center depth.
    counts_ref : SMEM (B,)        int32 -- number of valid boxes per image.
    probs_ref  : VMEM (bt, H, W)  f32   -- predicted object probs block.
    out_ref    : VMEM (1, 1, 1)   f32   -- this step's sum of squared errors.
    """
    g = pl.program_id(0)
    _, H, W = probs_ref.shape

    # Hoisted once per grid step; reused by every box of every image.
    rows = jax.lax.broadcasted_iota(jnp.int32, (H, 1), 0)
    cols = jax.lax.broadcasted_iota(jnp.int32, (1, W), 1)

    def image_body(j, acc):
        b = g * bt + j
        n_valid = counts_ref[b]
        inv_n = 1.0 / jnp.maximum(n_valid, 1).astype(jnp.float32)
        base = b * (4 * maxn)

        def box_body(n, target):
            off = base + 4 * n
            u1 = boxes_ref[off + 0]
            v1 = boxes_ref[off + 1]
            u2 = boxes_ref[off + 2]
            v2 = boxes_ref[off + 3]
            val = (n_valid - n).astype(jnp.float32) * inv_n
            # Separable box mask: tiny (H,1)/(1,W) boolean indicators, then a
            # single broadcast AND + one select over the full plane.
            row_in = (rows >= v1) & (rows < v2)
            col_in = (cols >= u1) & (cols < u2)
            # TODO(synk): negative box corners would need Python-slice wrap
            # semantics to match torch exactly; inputs here are non-negative.
            return jnp.where(row_in & col_in, val, target)

        # Target init matches torch.zeros(...) - 1.0; boxes are pre-sorted far
        # -> near, so later (closer) boxes overwrite earlier ones.
        target = jax.lax.fori_loop(
            0, n_valid, box_body, jnp.full((H, W), -1.0, jnp.float32))
        diff = probs_ref[j] - target
        return acc + diff * diff

    acc = jax.lax.fori_loop(0, bt, image_body, jnp.zeros((H, W), jnp.float32))
    # One cross-lane reduce + one tiny store per grid step (amortized over bt
    # images), written to this step's own output block.
    out_ref[0] = jnp.sum(acc, keepdims=True)


def obj_loss(object_probs, gt_boxes2d, num_gt_per_img, gt_center_depth):
    """JAX/Pallas equivalent of OBJLoss.forward (MSE against the built target)."""
    B, C, H, W = object_probs.shape
    assert C == 1
    probs = object_probs.reshape(B, H, W).astype(jnp.float32)

    # floor(u1, v1), ceil(u2, v2) -> integer boxes (fresh copy; PyTorch mutates
    # gt_boxes2d in place but uses the same values downstream).
    boxes_i = jnp.concatenate(
        [jnp.floor(gt_boxes2d[:, :2]), jnp.ceil(gt_boxes2d[:, 2:])], axis=1
    ).astype(jnp.int32)

    counts_np = np.asarray(num_gt_per_img, dtype=np.int32)
    total = int(counts_np.sum())
    maxn = max(int(counts_np.max()) if B > 0 else 0, 1)

    # Vectorized per-image descending-depth sort + pad: one stable lexsort
    # (primary key = image id, secondary = -depth) and one scatter, instead of
    # a per-image Python loop of small device ops.
    if total > 0:
        seg_np = np.repeat(np.arange(B, dtype=np.int32), counts_np)
        offs_np = np.zeros(B, dtype=np.int64)
        offs_np[1:] = np.cumsum(counts_np)[:-1]
        pos_np = (np.arange(total, dtype=np.int64)
                  - np.repeat(offs_np, counts_np)).astype(np.int32)
        seg = jnp.asarray(seg_np)
        order = jnp.lexsort((-gt_center_depth, seg))
        boxes_padded = jnp.zeros((B, maxn, 4), jnp.int32).at[
            seg, jnp.asarray(pos_np)].set(boxes_i[order])
    else:
        boxes_padded = jnp.zeros((B, maxn, 4), jnp.int32)

    boxes_flat = boxes_padded.reshape(B * maxn * 4)   # 1-D SMEM: tight padding
    counts_arr = jnp.asarray(counts_np)

    # Images per grid step: largest divisor of B whose block stays <= 2 MiB so
    # a double-buffered input block fits comfortably in scoped VMEM on every
    # generation (v7x: 64 MiB physical / 32 MiB default scoped).
    plane_bytes = H * W * 4
    bt = 1
    for d in range(1, B + 1):
        if B % d == 0 and d * plane_bytes <= (2 << 20):
            bt = d
    G = B // bt
    blk_bytes = bt * plane_bytes
    vmem_limit = int(min(32 << 20, max(16 << 20, 4 * blk_bytes + (4 << 20))))

    grid_spec = pltpu.PrefetchScalarGridSpec(
        num_scalar_prefetch=2,
        grid=(G,),
        in_specs=[
            pl.BlockSpec((bt, H, W), lambda g, boxes_s, counts_s: (g, 0, 0)),
        ],
        out_specs=pl.BlockSpec((1, 1, 1), lambda g, boxes_s, counts_s: (g, 0, 0)),
    )

    partials = pl.pallas_call(
        functools.partial(_obj_loss_kernel, maxn=maxn, bt=bt),
        out_shape=jax.ShapeDtypeStruct((G, 1, 1), jnp.float32),
        grid_spec=grid_spec,
        compiler_params=pltpu.CompilerParams(
            dimension_semantics=("parallel",),
            vmem_limit_bytes=vmem_limit,
        ),
    )(boxes_flat, counts_arr, probs)

    # nn.MSELoss default reduction='mean' over all B*1*H*W elements.
    return jnp.sum(partials) / (B * C * H * W)


def _reference_loss(object_probs, gt_boxes2d, num_gt_per_img, gt_center_depth):
    """Pure numpy re-implementation of the PyTorch module for verification."""
    probs = np.asarray(object_probs, dtype=np.float64)
    B, _, H, W = probs.shape
    boxes = np.asarray(gt_boxes2d, dtype=np.float64).copy()
    boxes[:, :2] = np.floor(boxes[:, :2])
    boxes[:, 2:] = np.ceil(boxes[:, 2:])
    boxes = boxes.astype(np.int64)
    depth = np.asarray(gt_center_depth, dtype=np.float64)
    target = np.full((B, H, W), -1.0, dtype=np.float64)
    off = 0
    for b, nb in enumerate(num_gt_per_img):
        bx = boxes[off:off + nb]
        dp = depth[off:off + nb]
        off += nb
        if nb == 0:
            continue
        order = np.argsort(-dp)
        bx = bx[order]
        for n in range(nb):
            u1, v1, u2, v2 = bx[n]
            target[b, v1:v2, u1:u2] = (nb - n) / nb
    return float(np.mean((probs - target[:, None]) ** 2))


if __name__ == "__main__":
    key = jax.random.PRNGKey(0)
    B, C, H, W = 2, 1, 16, 16
    num_gt_per_img = [3, 2]
    total = sum(num_gt_per_img)

    k1, k2, k3, k4 = jax.random.split(key, 4)
    object_probs = jax.random.uniform(k1, (B, C, H, W), dtype=jnp.float32)

    xy = jax.random.uniform(k2, (total, 2), dtype=jnp.float32, minval=0.0, maxval=6.0)
    wh = jax.random.uniform(k3, (total, 2), dtype=jnp.float32, minval=2.0, maxval=8.0)
    gt_boxes2d = jnp.concatenate([xy, xy + wh], axis=1)          # (u1, v1, u2, v2)
    gt_center_depth = jax.random.uniform(
        k4, (total,), dtype=jnp.float32, minval=1.0, maxval=50.0
    )

    loss = obj_loss(object_probs, gt_boxes2d, num_gt_per_img, gt_center_depth)
    loss = jax.block_until_ready(loss)

    ref = _reference_loss(object_probs, gt_boxes2d, num_gt_per_img, gt_center_depth)
    np.testing.assert_allclose(float(loss), ref, rtol=1e-4, atol=1e-5)

    print("KERNEL_OK")
</pallas_src>

<mosaic_0001>
module attributes {stable_mosaic.version = 11 : i64} {
  func.func @_obj_loss_kernel(%arg0: i32, %arg1: memref<24xi32, #tpu.memory_space<smem>>, %arg2: memref<2xi32, #tpu.memory_space<smem>>, %arg3: memref<2x16x16xf32, #tpu.memory_space<vmem>>, %arg4: memref<1x1x1xf32, #tpu.memory_space<vmem>>) attributes {dimension_semantics = [#tpu.dimension_semantics<parallel>], iteration_bounds = array<i64: 1>, scalar_prefetch = 2 : i64, scratch_operands = 0 : i64, tpu.core_type = #tpu.core_type<tc>, window_params = [{transform_indices = @transform_0, window_bounds = array<i64: 2, 16, 16>}, {transform_indices = @transform_1, window_bounds = array<i64: 1, 1, 1>}]} {
    %0 = tpu.iota {dimensions = array<i32: 0>} : vector<16x1xi32>
    %1 = tpu.iota {dimensions = array<i32: 1>} : vector<1x16xi32>
    %cst = arith.constant 0.000000e+00 : f32
    %2 = vector.broadcast %cst : f32 to vector<16x16xf32>
    %c0_i32 = arith.constant 0 : i32
    %c2_i32 = arith.constant 2 : i32
    %3 = arith.addi %c0_i32, %c2_i32 : i32
    %c1_i32 = arith.constant 1 : i32
    %4 = scf.for %arg5 = %c0_i32 to %3 step %c1_i32 iter_args(%arg6 = %2) -> (vector<16x16xf32>)  : i32 {
      %c2_i32_4 = arith.constant 2 : i32
      %13 = arith.muli %arg0, %c2_i32_4 : i32
      %14 = arith.addi %13, %arg5 : i32
      %15 = arith.index_cast %14 : i32 to index
      %16 = memref.load %arg2[%15] : memref<2xi32, #tpu.memory_space<smem>>
      %c1_i32_5 = arith.constant 1 : i32
      %17 = arith.maxsi %16, %c1_i32_5 : i32
      %18 = arith.sitofp %17 : i32 to f32
      %cst_6 = arith.constant 1.000000e+00 : f32
      %19 = arith.divf %cst_6, %18 : f32
      %c12_i32 = arith.constant 12 : i32
      %20 = arith.muli %14, %c12_i32 : i32
      %cst_7 = arith.constant -1.000000e+00 : f32
      %21 = vector.broadcast %cst_7 : f32 to vector<16x16xf32>
      %c0_i32_8 = arith.constant 0 : i32
      %22 = arith.subi %16, %c0_i32_8 : i32
      %23 = arith.addi %c0_i32_8, %22 : i32
      %c1_i32_9 = arith.constant 1 : i32
      %24 = scf.for %arg7 = %c0_i32_8 to %23 step %c1_i32_9 iter_args(%arg8 = %21) -> (vector<16x16xf32>)  : i32 {
        %c4_i32 = arith.constant 4 : i32
        %31 = arith.muli %c4_i32, %arg7 : i32
        %32 = arith.addi %20, %31 : i32
        %c0_i32_12 = arith.constant 0 : i32
        %33 = arith.addi %32, %c0_i32_12 : i32
        %34 = arith.index_cast %33 : i32 to index
        %35 = memref.load %arg1[%34] : memref<24xi32, #tpu.memory_space<smem>>
        %c1_i32_13 = arith.constant 1 : i32
        %36 = arith.addi %32, %c1_i32_13 : i32
        %37 = arith.index_cast %36 : i32 to index
        %38 = memref.load %arg1[%37] : memref<24xi32, #tpu.memory_space<smem>>
        %c2_i32_14 = arith.constant 2 : i32
        %39 = arith.addi %32, %c2_i32_14 : i32
        %40 = arith.index_cast %39 : i32 to index
        %41 = memref.load %arg1[%40] : memref<24xi32, #tpu.memory_space<smem>>
        %c3_i32 = arith.constant 3 : i32
        %42 = arith.addi %32, %c3_i32 : i32
        %43 = arith.index_cast %42 : i32 to index
        %44 = memref.load %arg1[%43] : memref<24xi32, #tpu.memory_space<smem>>
        %45 = arith.subi %16, %arg7 : i32
        %46 = arith.sitofp %45 : i32 to f32
        %47 = arith.mulf %46, %19 : f32
        %48 = vector.broadcast %38 : i32 to vector<16x1xi32>
        %49 = arith.cmpi sge, %0, %48 : vector<16x1xi32>
        %50 = vector.broadcast %44 : i32 to vector<16x1xi32>
        %51 = arith.cmpi slt, %0, %50 : vector<16x1xi32>
        %52 = arith.andi %49, %51 : vector<16x1xi1>
        %53 = vector.broadcast %35 : i32 to vector<1x16xi32>
        %54 = arith.cmpi sge, %1, %53 : vector<1x16xi32>
        %55 = vector.broadcast %41 : i32 to vector<1x16xi32>
        %56 = arith.cmpi slt, %1, %55 : vector<1x16xi32>
        %57 = arith.andi %54, %56 : vector<1x16xi1>
        %58 = vector.broadcast %52 : vector<16x1xi1> to vector<16x16xi1>
        %59 = vector.broadcast %57 : vector<1x16xi1> to vector<16x16xi1>
        %60 = arith.andi %58, %59 : vector<16x16xi1>
        %61 = vector.broadcast %47 : f32 to vector<16x16xf32>
        %62 = arith.select %60, %61, %arg8 : vector<16x16xi1>, vector<16x16xf32>
        scf.yield %62 : vector<16x16xf32>
      }
      %25 = arith.index_cast %arg5 : i32 to index
      %c0_10 = arith.constant 0 : index
      %c0_11 = arith.constant 0 : index
      %26 = vector.load %arg3[%25, %c0_10, %c0_11] : memref<2x16x16xf32, #tpu.memory_space<vmem>>, vector<1x16x16xf32>
      %27 = vector.shape_cast %26 : vector<1x16x16xf32> to vector<16x16xf32>
      %28 = arith.subf %27, %24 : vector<16x16xf32>
      %29 = arith.mulf %28, %28 : vector<16x16xf32>
      %30 = arith.addf %arg6, %29 : vector<16x16xf32>
      scf.yield %30 : vector<16x16xf32>
    }
    %c2_i32_0 = arith.constant 2 : i32
    %5 = vector.shape_cast %4 : vector<16x16xf32> to vector<1x16x16xf32>
    %cst_1 = arith.constant dense<0.000000e+00> : vector<1xf32>
    %6 = vector.multi_reduction <add>, %5, %cst_1 [1, 2] : vector<1x16x16xf32> to vector<1xf32>
    %7 = vector.shape_cast %6 : vector<1xf32> to vector<1x1x1xf32>
    %8 = vector.extract %7[0, 0, 0] : f32 from vector<1x1x1xf32>
    %9 = vector.broadcast %8 : f32 to vector<1x1xf32>
    %c0 = arith.constant 0 : index
    %c0_2 = arith.constant 0 : index
    %c0_3 = arith.constant 0 : index
    %10 = vector.load %arg4[%c0, %c0_2, %c0_3] : memref<1x1x1xf32, #tpu.memory_space<vmem>>, vector<1x1x1xf32>
    %11 = vector.shape_cast %10 : vector<1x1x1xf32> to vector<1x1xf32>
    %12 = vector.shape_cast %9 : vector<1x1xf32> to vector<1x1x1xf32>
    tpu.vector_store %arg4[%c0, %c0_2, %c0_3], %12 {strides = array<i32>} : memref<1x1x1xf32, #tpu.memory_space<vmem>>, vector<1x1x1xf32>,
    return
  }
  func.func @transform_0(%arg0: i32, %arg1: memref<24xi32, #tpu.memory_space<smem>>, %arg2: memref<2xi32, #tpu.memory_space<smem>>) -> (i32, i32, i32) {
    %c0_i32 = arith.constant 0 : i32
    %c0_i32_0 = arith.constant 0 : i32
    %c0_i32_1 = arith.constant 0 : i32
    return %arg0, %c0_i32, %c0_i32_0 : i32, i32, i32
  }
  func.func @transform_1(%arg0: i32, %arg1: memref<24xi32, #tpu.memory_space<smem>>, %arg2: memref<2xi32, #tpu.memory_space<smem>>) -> (i32, i32, i32) {
    %c0_i32 = arith.constant 0 : i32
    %c0_i32_0 = arith.constant 0 : i32
    %c0_i32_1 = arith.constant 0 : i32
    return %arg0, %c0_i32, %c0_i32_0 : i32, i32, i32
  }
}

</mosaic_0001>

<bundles_post_ra>
// kernel: tpu_custom_call.1
= control target key start
LH: loop header
LB: loop body
LE: loop exit
PB: predicated region body
PF: predicated region fallthrough
CT: control target
= control target key end

     0   :  { %s507_s0 = inlined_call_operand.hbm [shape: s32[24], index: 0, kind: input, shape index: {}]   ;;  %s508_s2 = inlined_call_operand.hbm [shape: f32[2,16,16], index: 2, kind: input, shape index: {}]   ;;  %s509_s3 = inlined_call_operand.hbm [shape: f32[1,1,1], index: 3, kind: output, shape index: {}]   ;;  %s510_s1 = inlined_call_operand.vmem [shape: s32[2], index: 1, kind: input, shape index: {}]  }
   0x1   :  { %s244_s14 = scalar_lea.hbm %s507_s0, 16 }
   0x2   :  { %p245_p0 = scmp.ne.s32.totalorder %s507_s0, %s244_s14  ;;  %p248_p1 = scmp.lt.u32.totalorder %s244_s14, %s507_s0 }
   0x4   :  { %p250_p2 = pnand %p248_p1, %p245_p0 }
   0x6   :  { %253 = shalt.err (!%p250_p2)  }
   0x7   :  { %s380_s19 = smov [#allocation3]   ;;  %s10_s24 = sshll.u32 %s510_s1, 4  ;;  %s11_s24 = int_to_ptr.vmem [resolvable:$true] %s10_s24 }
   0x8   :  { %9 = dma.hbm_to_smem %s507_s0, 16, %s380_s19, [#allocation2] }
   0x9   :  { %s254_s25 = scalar_lea.vmem %s11_s24, 16  ;;  %p259_p4 = scmp.lt.s32.totalorder %s11_s24, %s11_s24 }
   0xa   :  { %p255_p3 = scmp.ne.s32.totalorder %s11_s24, %s254_s25  ;;  %p260_p5 = scmp.lt.s32.totalorder %s254_s25, %s254_s25 }
   0xc   :  { %p261_p6 = por %p260_p5, %p259_p4 }
   0xe   :  { %p262_p7 = pnand %p261_p6, %p255_p3 }
  0x10   :  { %265 = shalt.err (!%p262_p7)  }
  0x11   :  { %s381_s26 = smov [#allocation4]  }
  0x12   :  { %13 = dma.vmem_to_smem %s11_s24, 16, %s381_s26, [#allocation2] }
  0x13   :  { %342 = dma.done.wait [#allocation2], 32 }
  0x14   :  { %343 = vsyncadd [#allocation2], 4294967264 }
  0x15   :  { %15 = sfence }
  0x16   :  { %16 = vsyncpa [#allocation6], 0 }
  0x17   :  { %17 = vsyncpa [#allocation7], 0  ;;  %s382_s0 = smov [#allocation5]   ;;  %s266_s29 = scalar_lea.hbm %s508_s2, 512 }
  0x18   :  { %s23_s27 = sshll.u32 %s382_s0, 4  ;;  %p267_p8 = scmp.ne.s32.totalorder %s508_s2, %s266_s29  ;;  %s24_s27 = int_to_ptr.vmem [resolvable:$true] %s23_s27 }
  0x19   :  { %p270_p9 = scmp.lt.u32.totalorder %s266_s29, %s508_s2 }
  0x1b   :  { %p272_p10 = pnand %p270_p9, %p267_p8 }
  0x1d   :  { %275 = shalt.err (!%p272_p10)
}
  0x1e   :  { %s276_s7 = scalar_lea.vmem %s24_s27, 512  ;;  %p281_p12 = scmp.lt.s32.totalorder %s24_s27, %s24_s27 }
  0x1f   :  { %p277_p11 = scmp.ne.s32.totalorder %s24_s27, %s276_s7  ;;  %p282_p13 = scmp.lt.s32.totalorder %s276_s7, %s276_s7 }
  0x21   :  { %p283_p0 = por %p282_p13, %p281_p12 }
  0x23   :  { %p284_p1 = pnand %p283_p0, %p277_p11 }
  0x25   :  { %287 = shalt.err (!%p284_p1)
}
  0x26   :  { %s383_s8 = smov 128   ;;  %s384_s9 = smov 8  }
  0x27   :  { %29 = dma.hbm_to_vmem [thread:$0]  %s508_s2, 512, %s24_s27, [#allocation6], %s383_s8, %s383_s8, %s384_s9  }
  0x28   :  { %344 = dma.done.wait [#allocation6], 512  }
  0x29   :  { %345 = vsyncadd [#allocation6], 4294966784  ;;  %v33_v0 = vlaneseq  ;;  %v440_v4 = vmov 0.0   ;;  %v442_v5 = vmov 0.0   ;;  %s444_s12 = smov 0  }
  0x2b   :  { %v433_v1 = vshrl.u32 %v33_v0, 7  ;;  %v435_v2 = vand.u32 127, %v33_v0 }
  0x2d   :  { %v438_v3 = vadd.s32 8, %v433_v1 }
  0x2e LB: > { %s456_s2 = sld [smem:[#allocation4 + %s358_s12]]  ;;  %s55_s13 = smul.u32 12, %s358_s12  ;;  %v372_v8 = vmov -1.0   ;;  %v376_v9 = vmov -1.0   ;;  %s358_s12 = sphi %s444_s12, %s43_s12   ;;  %v354_v5 = vphi %v442_v5, %v512_v5   ;;  %v350_v4 = vphi %v440_v4, %v511_v4  }
  0x34   : > { %p49_p2 = scmp.gt.s32.totalorder %s456_s2, 1  ;;  %p165_p3 = scmp.le.s32.totalorder %s456_s2, 0 }
  0x35   : > { %v360_v10 = vmov (!%p165_p3), -1.0   ;;  %v364_v11 = vmov (!%p165_p3), -1.0   ;;  %s464_s17 = smov (!%p165_p3), 0  }
  0x36   : > { %s50_s14 = scalar_select %p49_p2, %s456_s2, 1 }
  0x38   : > { %s51_s15 = scvt.s32.f32 %s50_s14 }
  0x3a   : > { %v52_v6 = vstv %s51_s15 }
  0x3b   : > { %242 = vrcp.f32 %v52_v6 }
  0x45   : > { %v243_v7 = vpop.eup %242 }
  0x46   : > { %168 = vpush %v243_v7 }
  0x71   : > { %147 = sbr.rel (%p165_p3) target bundleno = 139 (0x8b), region = 37 }
  0x77   : > { %s461_s16 = spop %168 }
  0x78 LB: >> { %s166_s18 = sshll.u32 %s370_s17, 2  ;;  %s73_s20 = ssub.s32 %s456_s2, %s370_s17  ;;  %s370_s17 = sphi %s464_s17, %s59_s17   ;;  %v366_v11 = vphi %v364_v11, %v365_v11   ;;  %v362_v10 = vphi %v360_v10, %v361_v10  }
  0x79   : >> { %s65_s19 = sadd.s32 %s166_s18, %s55_s13  ;;  %s74_s27 = scvt.s32.f32 %s73_s20 }
  0x7a   : >> { %s66_s21 = sld [smem:[#allocation3 + %s65_s19]]  ;;  %s67_s22 = sadd.s32 1, %s65_s19 }
  0x7b   : >> { %s68_s23 = sld [smem:[#allocation3 + %s67_s22]]  ;;  %s69_s24 = sadd.s32 2, %s65_s19 }
  0x7c   : >> { %s70_s25 = sld [smem:[#allocation3 + %s69_s24]]  ;;  %s71_s26 = sadd.s32 3, %s65_s19 }
  0x7d   : >> { %s72_s0 = sld [smem:[#allocation3 + %s71_s26]]  ;;  %s75_s28 = smul.f32 %s461_s16, %s74_s27 }
  0x7e   : >> { %s59_s17 = sadd.s32 1, %s370_s17  }
  0x7f   : >> { %v97_v16 = vstv %s75_s28  ;;  %p58_p4 = scmp.ge.s32.totalorder %s59_s17, %s456_s2 }
  0x80   : >> { %v84_v12 = vstv %s66_s21 }
  0x81   : >> { %v76_v13 = vstv %s68_s23  ;;  %vm85_vm0 = vcmp.ge.s32.totalorder %v435_v2, %v84_v12 }
  0x82   : >> { %vm77_vm1 = vcmp.ge.s32.totalorder %v433_v1, %v76_v13  ;;  %v86_v14 = vstv %s70_s25  ;;  %vm78_vm2 = vcmp.ge.s32.totalorder %v438_v3, %v76_v13 }
  0x83   : >> { %v79_v15 = vstv %s72_s0  ;;  %vm87_vm3 = vcmp.lt.s32.totalorder %v435_v2, %v86_v14 }
  0x84   : >> { %vm80_vm4 = vcmp.lt.s32.totalorder %v433_v1, %v79_v15  ;;  %vm81_vm5 = vcmp.lt.s32.totalorder %v438_v3, %v79_v15  ;;  %vm88_vm6 = vmand %vm85_vm0, %vm87_vm3  ;;  %61 = sbr.rel (!%p58_p4) target bundleno = 120 (0x78), region = 43 }
  0x85   : >> { %vm82_vm7 = vmand %vm77_vm1, %vm80_vm4 }
  0x86   : >> { %vm83_vm8 = vmand %vm78_vm2, %vm81_vm5 }
  0x87   : >> { %vm95_vm9 = vmand %vm82_vm7, %vm88_vm6 }
  0x88   : >> { %vm96_vm10 = vmand %vm83_vm8, %vm88_vm6  ;;  %v98_v17 = vsel %vm95_vm9, %v97_v16, %v366_v11  }
  0x89   : >> { %v99_v18 = vsel %vm96_vm10, %v97_v16, %v362_v10   ;;  %v365_v11 = vmov %v98_v17   ;;  %v377_v9 = vmov (%p58_p4), %v98_v17  }
  0x8a   : >> { %v361_v10 = vmov %v99_v18   ;;  %v373_v8 = vmov (%p58_p4), %v99_v18  }
  0x8b PF: > { %s167_s1 = sshll.u32 %s358_s12, 4  ;;  %s43_s12 = sadd.s32 1, %s358_s12   ;;  %v378_v9 = vphi %v376_v9, %v377_v9   ;;  %v374_v8 = vphi %v372_v8, %v373_v8  }
  0x8c   : > { %s101_s29 = scalar_lea.vmem [#allocation5], %s167_s1  ;;  %p40_p5 = scmp.ge.s32.totalorder %s43_s12, 2  }
  0x8d   : > { %v102_v19 = vld [vmem:[%s101_s29] sm:$0xff]  ;;  %v103_v20 = vld [vmem:[%s101_s29 + $0x8] sm:$0xff]  ;;  %vm110_vm11 = vcmask (%p40_p5), 130048   ;;  %s385_s30 = smov (%p40_p5), [#allocation8]   ;;  %vm124_vm12 = vcmask (%p40_p5), 0  }
  0x8e   : > { %v104_v21 = vsub.f32 %v102_v19, %v378_v9  ;;  %v105_v22 = vsub.f32 %v103_v20, %v374_v8  ;;  %42 = sbr.rel (!%p40_p5) target bundleno = 46 (0x2e), region = 54  ;;  %s132_s4 = sshll.u32 (%p40_p5), %s385_s30, 4  ;;  %s133_s4 = int_to_ptr.vmem [resolvable:$true] %s132_s4 }
  0x8f   :  { %s288_s6 = scalar_lea.vmem (%p40_p5), %s133_s4, 16  ;;  %s292_s7 = scalar_lea.vmem (%p40_p5), %s133_s4, 32 }
  0x90   : > { %v106_v23 = vmul.f32 %v104_v21, %v104_v21  ;;  %v107_v24 = vmul.f32 %v105_v22, %v105_v22  ;;  %p289_p6 = scmp.ne.s32.totalorder (%p40_p5), %s133_s4, %s288_s6  ;;  %p293_p7 = scmp.lt.s32.totalorder (%p40_p5), %s133_s4, %s133_s4 }
  0x91   :  { %p294_p8 = scmp.lt.s32.totalorder (%p40_p5), %s292_s7, %s288_s6 }
  0x92   : > { %v108_v25 = vadd.f32 %v354_v5, %v106_v23   ;;  %v109_v26 = vadd.f32 %v350_v4, %v107_v24  }
  0x93   :  { %p295_p9 = por (%p40_p5), %p294_p8, %p293_p7 }
  0x94   : > { %v511_v4 = vmov %v109_v26  ;;  %v512_v5 = vmov %v108_v25  ;;  %v111_v27 = vsel (%p40_p5), %vm110_vm11, %v108_v25, 0.0  ;;  %v112_v28 = vsel (%p40_p5), %vm110_vm11, %v109_v26, 0.0 }
  0x95   :  { %v113_v29 = vadd.f32 %v112_v28, %v111_v27  ;;  %p296_p10 = pnand %p295_p9, %p289_p6 }
  0x97   :  { %114 = vadd.xlane.f32.xlu0 %v113_v29 }
 0x124   :  { %v115_v30 = vpop.xlane.xlu0 %114 }
 0x125   :  { %v116_v31 = vrot.slane %v115_v30, 4 }
 0x127   :  { %v117_v32 = vadd.f32 %v116_v31, %v115_v30 }
 0x129   :  { %v118_v33 = vrot.slane %v117_v32, 2 }
 0x12b   :  { %v119_v34 = vadd.f32 %v118_v33, %v117_v32 }
 0x12d   :  { %v120_v35 = vrot.slane %v119_v34, 1 }
 0x12f   :  { %v121_v36 = vadd.f32 %v120_v35, %v119_v34 }
 0x131   :  { %170 = vpush %v121_v36 }
 0x162   :  { %s171_s5 = spop %170 }
 0x163   :  { %v123_v37 = vstv %s171_s5 }
 0x164   :  { %125 = vst.msk [vmem:[#allocation8] sm:$0x1] %vm124_vm12, %v123_v37 }
 0x165   :  { %299 = shalt.err (!%p296_p10)
}
 0x166   :  { %s300_s10 = scalar_lea.hbm %s509_s3, 16 }
 0x167   :  { %p301_p11 = scmp.ne.s32.totalorder %s509_s3, %s300_s10  ;;  %p304_p12 = scmp.lt.u32.totalorder %s300_s10, %s509_s3 }
 0x169   :  { %p306_p13 = pnand %p304_p12, %p301_p11 }
 0x16b   :  { %309 = shalt.err (!%p306_p13)
}
 0x16c   :  { %135 = dma.vmem_to_hbm [thread:$0]  %s133_s4, 16, %s509_s3, [#allocation7]  }
 0x16d   :  { %346 = dma.done.wait [#allocation7], 16  }
 0x16e   :  { %347 = vsyncadd [#allocation7], 4294967280 }
 0x16f   :  { %139 = vsyncpa [#allocation6], 1 }
 0x170   :  { %140 = vsyncpa [#allocation7], 1 }

</bundles_post_ra>
